<compile_context>
chip_gen: v6e
topology: v6e:2x2x1
jax: 0.10.0
libtpu: 0.0.40
codegen_flags: <defaults>
</compile_context>

<pallas_src>
import functools

import jax
import jax.numpy as jnp
from jax.experimental import pallas as pl
from jax.experimental.pallas import tpu as pltpu


# ---------------------------------------------------------------------------
# Helpers
# ---------------------------------------------------------------------------
def _seq_tile(n, cap=128):
    """Largest tile <= cap that divides n exactly (keys must never be padded)."""
    t = max(1, min(n, cap))
    while n % t:
        t -= 1
    return t


def _prep_params(w_qkv, b_qkv, w_proj, b_proj, *, dim, head_dim):
    """torch-layout params -> kernel-layout params.

    - transpose to (in, out) matmul layout,
    - fold the 1/sqrt(head_dim) softmax scale into the q columns of W_qkv /
      b_qkv (linear => exactly equivalent, zero runtime cost),
    - cast weights to bf16 (halves HBM + VMEM traffic; kernels accumulate f32).
    """
    scale = head_dim ** -0.5
    col_scale = jnp.concatenate(
        [jnp.full((dim,), scale, jnp.float32), jnp.ones((2 * dim,), jnp.float32)]
    )
    w1 = (jnp.transpose(w_qkv) * col_scale[None, :]).astype(jnp.bfloat16)  # (C, 3C)
    b1 = (b_qkv.astype(jnp.float32) * col_scale).reshape(1, -1)            # (1, 3C)
    w2 = jnp.transpose(w_proj).astype(jnp.bfloat16)                        # (C, C)
    b2 = b_proj.astype(jnp.float32).reshape(1, -1)                         # (1, C)
    return w1, b1, w2, b2


# ---------------------------------------------------------------------------
# Kernel 1: tiled  (M, K) @ (K, N) + bias(1, N) -> (M, N)
#   bf16 MXU operands, f32 accumulation, single cast at the store.
# ---------------------------------------------------------------------------
def _linear_bias_kernel(x_ref, w_ref, b_ref, o_ref):
    acc = jnp.dot(
        x_ref[...].astype(jnp.bfloat16),
        w_ref[...].astype(jnp.bfloat16),
        preferred_element_type=jnp.float32,
    )
    o_ref[...] = (acc + b_ref[...].astype(jnp.float32)).astype(o_ref.dtype)


def _linear(x2d, w_kn, b_row, *, out_dtype, tm_cap=512, tn_cap=512,
            vmem_limit_bytes=32 * 1024 * 1024):
    """y = x2d @ w_kn + b_row, tiled over rows (M) and output features (N)."""
    M, K = x2d.shape
    N = w_kn.shape[1]
    TM = M if M <= tm_cap else tm_cap          # full M or 512 (multiple of 8)
    TN = N if N <= tn_cap else tn_cap          # full N or 512 (multiple of 128)
    n_m = pl.cdiv(M, TM)
    n_n = pl.cdiv(N, TN)
    grid = (n_m, n_n)

    if n_n == 1 and n_m > 1:
        # Weight/bias index never changes across the grid -> keep them VMEM
        # resident with a single buffer (perf-review item: avoid 2x buffers).
        w_spec = pl.BlockSpec((K, TN), lambda i, j: (0, 0),
                              pipeline_mode=pl.Buffered(1))
        b_spec = pl.BlockSpec((1, TN), lambda i, j: (0, 0),
                              pipeline_mode=pl.Buffered(1))
    else:
        w_spec = pl.BlockSpec((K, TN), lambda i, j: (0, j))
        b_spec = pl.BlockSpec((1, TN), lambda i, j: (0, j))

    cost = pl.CostEstimate(
        flops=2 * M * K * N,
        transcendentals=0,
        bytes_accessed=int(M * K * jnp.dtype(x2d.dtype).itemsize
                           + K * N * jnp.dtype(w_kn.dtype).itemsize
                           + M * N * jnp.dtype(out_dtype).itemsize
                           + N * 4),
    )
    return pl.pallas_call(
        _linear_bias_kernel,
        out_shape=jax.ShapeDtypeStruct((M, N), out_dtype),
        grid=grid,
        in_specs=[
            pl.BlockSpec((TM, K), lambda i, j: (i, 0)),   # activation tiles
            w_spec,                                       # weight tiles (bf16)
            b_spec,                                       # bias tiles (f32)
        ],
        out_specs=pl.BlockSpec((TM, TN), lambda i, j: (i, j)),
        compiler_params=pltpu.CompilerParams(
            dimension_semantics=("parallel", "parallel"),
            vmem_limit_bytes=vmem_limit_bytes,
        ),
        cost_estimate=cost,
    )(x2d, w_kn, b_row)


# ---------------------------------------------------------------------------
# Kernel 2: flash-style per-(batch, head) attention.
#   grid = (B, H, Nq_tiles, Nkv_tiles); running m/l/acc in VMEM scratch.
#   q is pre-scaled (scale folded into W_qkv); causal mask built from iota.
# ---------------------------------------------------------------------------
def _flash_attn_kernel(q_ref, k_ref, v_ref, o_ref, m_sc, l_sc, acc_sc,
                       *, tq, tk, causal):
    qi = pl.program_id(2)
    ki = pl.program_id(3)

    @pl.when(ki == 0)
    def _init():
        m_sc[...] = jnp.full_like(m_sc, -jnp.inf)
        l_sc[...] = jnp.zeros_like(l_sc)
        acc_sc[...] = jnp.zeros_like(acc_sc)

    def _step():
        q = q_ref[...]                                    # (tq, hd) bf16 (pre-scaled)
        k = k_ref[...]                                    # (tk, hd) bf16
        v = v_ref[...]                                    # (tk, hd) bf16
        # q @ k^T on the MXU, f32 accumulation.
        s = jax.lax.dot_general(q, k, (((1,), (1,)), ((), ())),
                                preferred_element_type=jnp.float32)   # (tq, tk)
        if causal:
            # In-kernel causal mask (VPU iota + select): no N x N mask tensor.
            row = jax.lax.broadcasted_iota(jnp.int32, (tq, tk), 0) + qi * tq
            col = jax.lax.broadcasted_iota(jnp.int32, (tq, tk), 1) + ki * tk
            s = s + jnp.where(row >= col, 0.0, -1e9).astype(jnp.float32)

        # Online (flash) softmax update, all stats in f32.
        m_prev = m_sc[...]
        m_new = jnp.maximum(m_prev, jnp.max(s, axis=-1, keepdims=True))
        alpha = jnp.exp(m_prev - m_new)
        p = jnp.exp(s - m_new)
        l_sc[...] = alpha * l_sc[...] + jnp.sum(p, axis=-1, keepdims=True)
        acc_sc[...] = alpha * acc_sc[...] + jax.lax.dot_general(
            p.astype(v.dtype), v, (((1,), (0,)), ((), ())),
            preferred_element_type=jnp.float32)
        m_sc[...] = m_new

    if causal:
        # Skip KV tiles that are entirely above the diagonal.
        pl.when(ki * tk <= qi * tq + (tq - 1))(_step)
    else:
        _step()

    @pl.when(ki == pl.num_programs(3) - 1)
    def _finalize():
        inv_l = pl.reciprocal(l_sc[...], approx=True)      # EUP slot, nearly free
        o_ref[...] = (acc_sc[...] * inv_l).astype(o_ref.dtype)


def _flash_mha(qkv5, *, num_heads, head_dim, causal, seq_tile_cap=128,
               vmem_limit_bytes=32 * 1024 * 1024):
    """qkv5: (B, N, 3, H, hd) bf16 (a pure view of the fused qkv projection).

    Returns context in (B, N, H, hd) order so the head merge is a free reshape.
    """
    B, N, _, H, hd = qkv5.shape
    assert H == num_heads and hd == head_dim
    tq = _seq_tile(N, seq_tile_cap)
    tk = tq
    grid = (B, H, N // tq, N // tk)

    qkv_block = (None, tq, None, None, hd)                 # squeezed -> (tq, hd) refs
    q_spec = pl.BlockSpec(qkv_block, lambda b, h, qi, ki: (b, qi, 0, h, 0))
    k_spec = pl.BlockSpec(qkv_block, lambda b, h, qi, ki: (b, ki, 1, h, 0))
    v_spec = pl.BlockSpec(qkv_block, lambda b, h, qi, ki: (b, ki, 2, h, 0))
    out_spec = pl.BlockSpec((None, tq, None, hd),
                            lambda b, h, qi, ki: (b, qi, h, 0))

    itemsize = jnp.dtype(qkv5.dtype).itemsize
    cost = pl.CostEstimate(
        flops=4 * B * H * N * N * hd,                      # QK^T and PV matmuls
        transcendentals=B * H * N * N,                     # exp
        bytes_accessed=int(B * H * (N // tq) * (N // tk) * (tq + 2 * tk) * hd
                           * itemsize + B * N * H * hd * itemsize),
    )
    kernel = functools.partial(_flash_attn_kernel, tq=tq, tk=tk, causal=causal)
    return pl.pallas_call(
        kernel,
        out_shape=jax.ShapeDtypeStruct((B, N, H, hd), qkv5.dtype),
        grid=grid,
        in_specs=[q_spec, k_spec, v_spec],
        out_specs=out_spec,
        scratch_shapes=[
            pltpu.VMEM((tq, 1), jnp.float32),              # running max
            pltpu.VMEM((tq, 1), jnp.float32),              # running sum
            pltpu.VMEM((tq, hd), jnp.float32),             # running accumulator
        ],
        compiler_params=pltpu.CompilerParams(
            dimension_semantics=("parallel", "parallel", "parallel", "arbitrary"),
            vmem_limit_bytes=vmem_limit_bytes,
        ),
        cost_estimate=cost,
    )(qkv5, qkv5, qkv5)


# ---------------------------------------------------------------------------
# Module forward (matches Attention.forward)
# ---------------------------------------------------------------------------
def attention_forward(x, w_qkv, b_qkv, w_proj, b_proj, *, num_heads,
                      causal=True, seq_tile_cap=128):
    """x: (B, N, C); w_qkv: (3C, C); w_proj: (C, C)  (torch nn.Linear layouts)."""
    B, N, C = x.shape
    H = num_heads
    hd = C // H
    w1, b1, w2, b2 = _prep_params(w_qkv, b_qkv, w_proj, b_proj, dim=C, head_dim=hd)

    # 1) Fused QKV projection (bf16 intermediate halves HBM traffic downstream).
    qkv = _linear(x.reshape(B * N, C), w1, b1, out_dtype=jnp.bfloat16)   # (B*N, 3C)

    # 2) Head split is a pure view; attention reads straight from it.
    qkv5 = qkv.reshape(B, N, 3, H, hd)
    ctx = _flash_mha(qkv5, num_heads=H, head_dim=hd, causal=causal,
                     seq_tile_cap=seq_tile_cap)                          # (B, N, H, hd)

    # 3) Head merge is a pure view; output projection back to f32.
    out = _linear(ctx.reshape(B * N, C), w2, b2, out_dtype=x.dtype)
    # attn_drop / proj_drop are p=0.0 (inference) -> identity.
    return out.reshape(B, N, C)


# ---------------------------------------------------------------------------
# Pure-JAX references
# ---------------------------------------------------------------------------
def reference_forward(x, w_qkv, b_qkv, w_proj, b_proj, *, num_heads,
                      causal_mask=None):
    """Exact f32 replica of the PyTorch module."""
    B, N, C = x.shape
    H = num_heads
    hd = C // H
    qkv = x @ w_qkv.T + b_qkv
    qkv = jnp.transpose(qkv.reshape(B, N, 3, H, hd), (2, 0, 3, 1, 4))
    q, k, v = qkv[0], qkv[1], qkv[2]
    attn = jnp.einsum("bhqd,bhkd->bhqk", q, k) * (hd ** -0.5)
    if causal_mask is not None:
        attn = attn + causal_mask
    attn = jax.nn.softmax(attn, axis=-1)
    ctx = jnp.einsum("bhqk,bhkd->bhqd", attn, v)
    out = jnp.transpose(ctx, (0, 2, 1, 3)).reshape(B, N, C)
    return out @ w_proj.T + b_proj


def reference_forward_bf16(x, w_qkv, b_qkv, w_proj, b_proj, *, num_heads,
                           causal_mask=None):
    """Reference mirroring the kernel's bf16-operand / f32-accumulate casts."""
    B, N, C = x.shape
    H = num_heads
    hd = C // H
    w1, b1, w2, b2 = _prep_params(w_qkv, b_qkv, w_proj, b_proj, dim=C, head_dim=hd)
    qkv = (jnp.dot(x.reshape(B * N, C).astype(jnp.bfloat16), w1,
                   preferred_element_type=jnp.float32) + b1).astype(jnp.bfloat16)
    qkv = qkv.reshape(B, N, 3, H, hd)
    q = jnp.transpose(qkv[:, :, 0], (0, 2, 1, 3))   # scale already folded into W
    k = jnp.transpose(qkv[:, :, 1], (0, 2, 1, 3))
    v = jnp.transpose(qkv[:, :, 2], (0, 2, 1, 3))
    s = jnp.einsum("bhqd,bhkd->bhqk", q, k, preferred_element_type=jnp.float32)
    if causal_mask is not None:
        s = s + causal_mask
    p = jax.nn.softmax(s, axis=-1)
    ctx = jnp.einsum("bhqk,bhkd->bhqd", p.astype(jnp.bfloat16), v,
                     preferred_element_type=jnp.float32).astype(jnp.bfloat16)
    merged = jnp.transpose(ctx, (0, 2, 1, 3)).reshape(B * N, C)
    out = jnp.dot(merged, w2, preferred_element_type=jnp.float32) + b2
    return out.reshape(B, N, C).astype(x.dtype)


if __name__ == "__main__":
    # Small shapes consistent with the module: batch=2, seq=16, dim=32, 4 heads.
    B, N, C = 2, 16, 32
    num_heads = 4                       # head_dim = 8

    key = jax.random.PRNGKey(0)
    kx, kq, kp, kb = jax.random.split(key, 4)
    x = jax.random.normal(kx, (B, N, C), dtype=jnp.float32)
    # torch nn.Linear weight layout: (out_features, in_features)
    w_qkv = jax.random.normal(kq, (3 * C, C), dtype=jnp.float32) * (C ** -0.5)
    b_qkv = jnp.zeros((3 * C,), jnp.float32)            # qkv_bias=False
    w_proj = jax.random.normal(kp, (C, C), dtype=jnp.float32) * (C ** -0.5)
    b_proj = jax.random.normal(kb, (C,), dtype=jnp.float32) * 0.02

    # seq_tile_cap=8 -> 2 q-tiles x 2 kv-tiles: exercises the online-softmax
    # accumulation and the causal tile-skip even at this small N.
    out = attention_forward(x, w_qkv, b_qkv, w_proj, b_proj,
                            num_heads=num_heads, causal=True, seq_tile_cap=8)
    out = jax.block_until_ready(out)
    assert out.shape == (B, N, C)

    causal_mask = jnp.where(jnp.tril(jnp.ones((N, N), dtype=bool)),
                            0.0, -1e9).astype(jnp.float32)
    ref_bf16 = reference_forward_bf16(x, w_qkv, b_qkv, w_proj, b_proj,
                                      num_heads=num_heads,
                                      causal_mask=causal_mask)
    ref_f32 = reference_forward(x, w_qkv, b_qkv, w_proj, b_proj,
                                num_heads=num_heads, causal_mask=causal_mask)

    # Tight check vs a reference using the same bf16-operand casts; loose
    # sanity check vs the exact f32 PyTorch-equivalent reference.
    assert jnp.allclose(out, ref_bf16, atol=2e-2, rtol=2e-2), \
        "mismatch vs bf16-matched reference"
    assert jnp.allclose(out, ref_f32, atol=1e-1, rtol=1e-1), \
        "mismatch vs f32 reference"

    print("KERNEL_OK")
</pallas_src>

<mosaic_0001>
module attributes {stable_mosaic.version = 11 : i64} {
  func.func @_linear_bias_kernel(%arg0: i32, %arg1: i32, %arg2: memref<32x32xf32, #tpu.memory_space<vmem>>, %arg3: memref<32x96xbf16, #tpu.memory_space<vmem>>, %arg4: memref<1x96xf32, #tpu.memory_space<vmem>>, %arg5: memref<32x96xbf16, #tpu.memory_space<vmem>>) attributes {dimension_semantics = [#tpu.dimension_semantics<parallel>, #tpu.dimension_semantics<parallel>], iteration_bounds = array<i64: 1, 1>, scalar_prefetch = 0 : i64, scratch_operands = 0 : i64, tpu.core_type = #tpu.core_type<tc>, window_params = [{transform_indices = @transform_0, window_bounds = array<i64: 32, 32>}, {transform_indices = @transform_1, window_bounds = array<i64: 32, 96>}, {transform_indices = @transform_2, window_bounds = array<i64: 1, 96>}, {transform_indices = @transform_3, window_bounds = array<i64: 32, 96>}]} {
    %c0 = arith.constant 0 : index
    %c0_0 = arith.constant 0 : index
    %0 = vector.load %arg2[%c0, %c0_0] : memref<32x32xf32, #tpu.memory_space<vmem>>, vector<32x32xf32>
    %1 = arith.truncf %0 : vector<32x32xf32> to vector<32x32xbf16>
    %c0_1 = arith.constant 0 : index
    %c0_2 = arith.constant 0 : index
    %2 = vector.load %arg3[%c0_1, %c0_2] : memref<32x96xbf16, #tpu.memory_space<vmem>>, vector<32x96xbf16>
    %cst = arith.constant dense<0.000000e+00> : vector<32x96xf32>
    %3 = tpu.matmul %1, %2, %cst {dimension_numbers = #tpu.dot_dimension_numbers<[1], [0], [0], [1], [0, 0, 1, 1], [], []>} : vector<32x32xbf16>, vector<32x96xbf16>, vector<32x96xf32> -> vector<32x96xf32>
    %c0_3 = arith.constant 0 : index
    %c0_4 = arith.constant 0 : index
    %4 = vector.load %arg4[%c0_3, %c0_4] : memref<1x96xf32, #tpu.memory_space<vmem>>, vector<1x96xf32>
    %5 = vector.broadcast %4 : vector<1x96xf32> to vector<32x96xf32>
    %6 = arith.addf %3, %5 : vector<32x96xf32>
    %7 = arith.truncf %6 : vector<32x96xf32> to vector<32x96xbf16>
    %c0_5 = arith.constant 0 : index
    %c0_6 = arith.constant 0 : index
    %8 = vector.load %arg5[%c0_5, %c0_6] : memref<32x96xbf16, #tpu.memory_space<vmem>>, vector<32x96xbf16>
    tpu.vector_store %arg5[%c0_5, %c0_6], %7 {strides = array<i32>} : memref<32x96xbf16, #tpu.memory_space<vmem>>, vector<32x96xbf16>,
    return
  }
  func.func @transform_0(%arg0: i32, %arg1: i32) -> (i32, i32) {
    %c0_i32 = arith.constant 0 : i32
    %c0_i32_0 = arith.constant 0 : i32
    return %arg0, %c0_i32 : i32, i32
  }
  func.func @transform_1(%arg0: i32, %arg1: i32) -> (i32, i32) {
    %c0_i32 = arith.constant 0 : i32
    %c0_i32_0 = arith.constant 0 : i32
    return %c0_i32, %arg1 : i32, i32
  }
  func.func @transform_2(%arg0: i32, %arg1: i32) -> (i32, i32) {
    %c0_i32 = arith.constant 0 : i32
    %c0_i32_0 = arith.constant 0 : i32
    return %c0_i32, %arg1 : i32, i32
  }
  func.func @transform_3(%arg0: i32, %arg1: i32) -> (i32, i32) {
    %c0_i32 = arith.constant 0 : i32
    return %arg0, %arg1 : i32, i32
  }
}

</mosaic_0001>

<bundles_post_ra>
// kernel: tpu_custom_call.1
= control target key start
LH: loop header
LB: loop body
LE: loop exit
PB: predicated region body
PF: predicated region fallthrough
CT: control target
= control target key end

     0   :  { %8 = vsyncpa [#allocation3], 0  ;;  %s317_s0 = inlined_call_operand.hbm [shape: f32[32,32], index: 0, kind: input, shape index: {}]   ;;  %s318_s1 = inlined_call_operand.hbm [shape: bf16[32,96], index: 1, kind: input, shape index: {}]   ;;  %s319_s2 = inlined_call_operand.vmem [shape: f32[1,96], index: 2, kind: input, shape index: {}]   ;;  %s320_s3 = inlined_call_operand.hbm [shape: bf16[32,96], index: 3, kind: output, shape index: {}]  }
   0x1   :  { %9 = vsyncpa [#allocation6], 0 }
   0x2   :  { %10 = vsyncpa [#allocation4], 0  ;;  %s268_s12 = smov [#allocation2]  }
   0x3   :  { %s16_s13 = sshll.u32 %s268_s12, 4  ;;  %s17_s13 = int_to_ptr.vmem [resolvable:$true] %s16_s13 }
   0x4   :  { %s210_s14 = scalar_lea.vmem %s17_s13, 512  ;;  %p215_p1 = scmp.lt.s32.totalorder %s17_s13, %s17_s13 }
   0x5   :  { %p211_p0 = scmp.ne.s32.totalorder %s17_s13, %s210_s14  ;;  %p216_p2 = scmp.lt.s32.totalorder %s210_s14, %s210_s14 }
   0x7   :  { %p217_p3 = por %p216_p2, %p215_p1 }
   0x9   :  { %p218_p4 = pnand %p217_p3, %p211_p0 }
   0xb   :  { %221 = shalt.err (!%p218_p4)
}
   0xc   :  { %s269_s15 = smov 128   ;;  %s270_s16 = smov 8  }
   0xd   :  { %22 = dma.hbm_to_vmem [thread:$0]  %s317_s0, 512, %s17_s13, [#allocation3], %s269_s15, %s269_s15, %s270_s16  }
   0xe   :  { %s271_s19 = smov [#allocation5]  }
   0xf   :  { %s28_s20 = sshll.u32 %s271_s19, 4  ;;  %s29_s20 = int_to_ptr.vmem [resolvable:$true] %s28_s20 }
  0x10   :  { %s230_s21 = scalar_lea.vmem %s29_s20, 256  ;;  %p235_p6 = scmp.lt.s32.totalorder %s29_s20, %s29_s20 }
  0x11   :  { %p231_p5 = scmp.ne.s32.totalorder %s29_s20, %s230_s21  ;;  %p236_p7 = scmp.lt.s32.totalorder %s230_s21, %s230_s21 }
  0x13   :  { %p237_p8 = por %p236_p7, %p235_p6 }
  0x15   :  { %p238_p9 = pnand %p237_p8, %p231_p5 }
  0x17   :  { %241 = shalt.err (!%p238_p9)
}
  0x18   :  { %s272_s22 = smov 64   ;;  %s273_s23 = smov 4  }
  0x19   :  { %34 = dma.hbm_to_vmem [thread:$0]  %s318_s1, 256, %s29_s20, [#allocation6], %s272_s22, %s272_s22, %s273_s23  }
  0x1a   :  { %262 = dma.done.wait [#allocation3], 512  }
  0x1b   :  { %263 = vsyncadd [#allocation3], 4294966784 }
  0x1c   :  { %264 = dma.done.wait [#allocation6], 256  }
  0x1d   :  { %265 = vsyncadd [#allocation6], 4294967040  ;;  %v200_v0 = vld [vmem:[#allocation5 + $0x8] sm:$0xff]   ;;  %v201_v1 = vld [vmem:[#allocation5] sm:$0xff]   ;;  %vm73_vm0 = vcmask 261120   ;;  %vm145_vm1 = vcmask 781312  }
  0x1e   :  { %185 = vmatprep.subr.bf16.mxu0 %v200_v0  ;;  %v44_v2 = vld [vmem:[#allocation2] sm:$0xff]  ;;  %v45_v3 = vld [vmem:[#allocation2 + $0x8] sm:$0xff]  ;;  %v46_v5 = vld [vmem:[#allocation2 + $0x10] sm:$0xff]  ;;  %s274_s26 = smov [#allocation7]  }
  0x1f   :  { %186 = vmatpush3.bf16.msra.mxu0 %v200_v0  ;;  %v48_v4 = vpack.c.bf16 %v45_v3, %v44_v2  ;;  %v47_v6 = vld [vmem:[#allocation2 + $0x18] sm:$0xff]  ;;  %v168_v8 = vld [vmem:[%s319_s2] ss:$0 sm:$0xff]  ;;  %s155_s27 = sshll.u32 %s274_s26, 4  ;;  %s156_s27 = int_to_ptr.vmem [resolvable:$true] %s155_s27 }
  0x20   :  { %187 = vmatprep.subr.bf16.mxu0 %v201_v1  ;;  %v49_v7 = vpack.c.bf16 %v47_v6, %v46_v5  ;;  %s242_s2 = scalar_lea.vmem %s156_s27, 256  ;;  %p247_p11 = scmp.lt.s32.totalorder %s156_s27, %s156_s27 }
  0x21   :  { %189 = vmatprep.mubr.msk.bf16.mxu0 %vm73_vm0, %v48_v4  ;;  %p243_p10 = scmp.ne.s32.totalorder %s156_s27, %s242_s2  ;;  %p248_p12 = scmp.lt.s32.totalorder %s242_s2, %s242_s2 }
  0x23   :  { %188 = vmatpush3.bf16.msra.mxu0 %v201_v1  ;;  %p249_p13 = por %p248_p12, %p247_p11 }
  0x25   :  { %p250_p0 = pnand %p249_p13, %p243_p10 }
  0x26   :  { %190 = vmatmul.mubr.msk.bf16.vlgmr.msra.gmra.mxu0 %vm73_vm0, %v49_v7 }
  0xe6   :  { %v191_v9 = vpop.f32.mrf.mxu0 }
  0xe7   :  { %v123_v10 = vadd.f32 %v191_v9, %v168_v8 }
  0xe8   :  { %v114_v11 = vpop.f32.mrf.mxu0 }
  0xe9   :  { %v179_v12 = vpack.c.bf16 %v123_v10, %v123_v10  ;;  %v115_v13 = vadd.f32 %v168_v8, %v114_v11 }
  0xea   :  { %v192_v14 = vpop.f32.mrf.mxu0 }
  0xeb   :  { %148 = vst.msk [vmem:[#allocation7 + $0x8] sm:$0xf] %vm145_vm1, %v179_v12  ;;  %v177_v15 = vpack.c.bf16 %v115_v13, %v115_v13  ;;  %v126_v16 = vadd.f32 %v192_v14, %v168_v8 }
  0xec   :  { %v117_v17 = vpop.f32.mrf.mxu0 }
  0xed   :  { %146 = vst.msk [vmem:[#allocation7] sm:$0xf] %vm145_vm1, %v177_v15  ;;  %v180_v18 = vpack.c.bf16 %v126_v16, %v126_v16  ;;  %v118_v19 = vadd.f32 %v168_v8, %v117_v17 }
  0xef   :  { %149 = vst.msk [vmem:[#allocation7 + $0xc] sm:$0xf] %vm145_vm1, %v180_v18  ;;  %v178_v20 = vpack.c.bf16 %v118_v19, %v118_v19 }
  0xf1   :  { %147 = vst.msk [vmem:[#allocation7 + $0x4] sm:$0xf] %vm145_vm1, %v178_v20 }
  0xf2   :  { %253 = shalt.err (!%p250_p0)
}
  0xf3   :  { %161 = dma.vmem_to_hbm [thread:$0]  %s156_s27, 256, %s320_s3, [#allocation4], %s272_s22, %s272_s22, %s273_s23  }
  0xf4   :  { %266 = dma.done.wait [#allocation4], 256  }
  0xf5   :  { %267 = vsyncadd [#allocation4], 4294967040 }
  0xf6   :  { %165 = vsyncpa [#allocation3], 1 }
  0xf7   :  { %166 = vsyncpa [#allocation6], 1 }
  0xf8   :  { %167 = vsyncpa [#allocation4], 1 }

</bundles_post_ra>
